<compile_context>
chip_gen: v7x
topology: tpu7x:2x2x1
jax: 0.10.0
libtpu: 0.0.40
codegen_flags: <defaults>
</compile_context>

<pallas_src>
import jax
import jax.numpy as jnp
from jax import lax
from jax.experimental import pallas as pl
from jax.experimental.pallas import tpu as pltpu


def _round_up(n, m):
    return ((n + m - 1) // m) * m


def _pad2(a, shape):
    return jnp.pad(a, [(0, shape[0] - a.shape[0]), (0, shape[1] - a.shape[1])])


def decoder2_kernel(x_ref, w1_ref, b1_ref, gamma_ref, beta_ref, w2_ref, b2_ref,
                    o_ref, hn_ref):
    # hn is independent of the grid position: compute it once per core at the first
    # inner-grid step over the FULL batch (exact BatchNorm training statistics) and
    # keep it resident in VMEM scratch for all output-feature tiles.
    @pl.when(pl.program_id(1) == 0)
    def _():
        h = jnp.dot(x_ref[...], w1_ref[...],
                    preferred_element_type=jnp.float32) + b1_ref[...]
        inv_b = 1.0 / h.shape[0]
        mean = jnp.sum(h, axis=0, keepdims=True) * inv_b
        diff = h - mean
        var = jnp.sum(diff * diff, axis=0, keepdims=True) * inv_b   # biased (training mode)
        inv_std = lax.rsqrt(var + 1e-5)                             # EUP slot (cheap)
        hn = diff * (inv_std * gamma_ref[...]) + beta_ref[...]
        hn_ref[...] = jnp.where(hn >= 0, hn, 0.01 * hn)             # LeakyReLU(0.01)

    y = jnp.dot(hn_ref[...], w2_ref[...],
                preferred_element_type=jnp.float32) + b2_ref[...]
    o_ref[...] = jnp.maximum(y, 0.0)                                # ReLU


def decoder2_forward(x, params):
    """x: (B, latent_dim) f32.  params: dict (weights stored as (in, out) = torch.W.T)."""
    w1, b1, gamma, beta, w2, b2 = (params["w1"], params["b1"], params["gamma"],
                                   params["beta"], params["w2"], params["b2"])
    B, L = x.shape
    F = w2.shape[1]

    # Lane-dense padded feature dims (multiples of 128).  Batch is never padded.
    Lp = _round_up(L, 128)
    TF = 512 if F > 512 else _round_up(F, 128)     # output-feature tile width
    Fp = _round_up(F, TF)
    nf = Fp // TF
    G = 2 if (nf >= 2 and nf % 2 == 0) else 1      # parallel groups (v7x: 2 TCs)
    NJ = nf // G

    # Zero padding is exact: padded w1/b1 columns give h==0 there; with beta padded to 0
    # the normalized value stays 0, and padded w2 rows/cols are 0, so outputs match.
    xp = _pad2(x, (B, Lp))
    w1p = _pad2(w1, (Lp, Lp))
    b1p = _pad2(b1, (1, Lp))
    gammap = _pad2(gamma, (1, Lp))
    betap = _pad2(beta, (1, Lp))
    w2p = _pad2(w2, (Lp, Fp))
    b2p = _pad2(b2, (1, Fp))

    cost = pl.CostEstimate(
        flops=int(2 * B * Lp * Lp * G + 2 * B * Lp * Fp + 10 * B * (Lp + Fp)),
        transcendentals=int(Lp * G),
        bytes_accessed=int(4 * (xp.size + w1p.size + b1p.size + gammap.size
                                + betap.size + w2p.size + b2p.size + B * Fp)),
    )

    out_padded = pl.pallas_call(
        decoder2_kernel,
        out_shape=jax.ShapeDtypeStruct((B, Fp), jnp.float32),
        grid_spec=pltpu.PrefetchScalarGridSpec(
            num_scalar_prefetch=0,
            grid=(G, NJ),
            in_specs=[
                pl.BlockSpec((B, Lp), lambda g, j: (0, 0)),            # x      (resident)
                pl.BlockSpec((Lp, Lp), lambda g, j: (0, 0)),           # w1     (resident)
                pl.BlockSpec((1, Lp), lambda g, j: (0, 0)),            # b1     (resident)
                pl.BlockSpec((1, Lp), lambda g, j: (0, 0)),            # gamma  (resident)
                pl.BlockSpec((1, Lp), lambda g, j: (0, 0)),            # beta   (resident)
                pl.BlockSpec((Lp, TF), lambda g, j: (0, g * NJ + j)),  # w2 tile (pipelined)
                pl.BlockSpec((1, TF), lambda g, j: (0, g * NJ + j)),   # b2 tile (pipelined)
            ],
            out_specs=pl.BlockSpec((B, TF), lambda g, j: (0, g * NJ + j)),
            scratch_shapes=[pltpu.VMEM((B, Lp), jnp.float32)],         # hn (full batch)
        ),
        compiler_params=pltpu.CompilerParams(
            dimension_semantics=("parallel", "arbitrary")),
        cost_estimate=cost,
    )(xp, w1p, b1p, gammap, betap, w2p, b2p)

    return out_padded[:, :F]


def init_params(key, latent_dim, output_feature):
    """Deterministic synthetic parameters (PyTorch-like uniform fan-in init)."""
    k1, k2, k3, k4 = jax.random.split(key, 4)
    bound1 = 1.0 / jnp.sqrt(latent_dim)
    w1 = jax.random.uniform(k1, (latent_dim, latent_dim), jnp.float32, -bound1, bound1)
    b1 = jax.random.uniform(k2, (1, latent_dim), jnp.float32, -bound1, bound1)
    gamma = jnp.ones((1, latent_dim), jnp.float32)     # BatchNorm1d affine init
    beta = jnp.zeros((1, latent_dim), jnp.float32)
    bound2 = 1.0 / jnp.sqrt(latent_dim)
    w2 = jax.random.uniform(k3, (latent_dim, output_feature), jnp.float32, -bound2, bound2)
    b2 = jax.random.uniform(k4, (1, output_feature), jnp.float32, -bound2, bound2)
    return dict(w1=w1, b1=b1, gamma=gamma, beta=beta, w2=w2, b2=b2)


def decoder2_reference(x, p):
    hi = lax.Precision.HIGHEST
    h = jnp.dot(x, p["w1"], precision=hi) + p["b1"]
    mean = h.mean(axis=0, keepdims=True)
    var = ((h - mean) ** 2).mean(axis=0, keepdims=True)
    hn = (h - mean) / jnp.sqrt(var + 1e-5) * p["gamma"] + p["beta"]
    hn = jnp.where(hn >= 0, hn, 0.01 * hn)
    y = jnp.dot(hn, p["w2"], precision=hi) + p["b2"]
    return jnp.maximum(y, 0.0)


if __name__ == "__main__":
    # Config 1: tiny original sizes.  Config 2: exercises feature padding (100 -> 128),
    # output-feature tiling (2048 = 4 tiles of 512) and the 2-way parallel outer axis.
    configs = [
        dict(batch=8, latent_dim=32, output_feature=64),
        dict(batch=16, latent_dim=100, output_feature=2048),
    ]

    key = jax.random.PRNGKey(0)
    for cfg in configs:
        key, kx, kp = jax.random.split(key, 3)
        x = jax.random.normal(kx, (cfg["batch"], cfg["latent_dim"]), jnp.float32)
        params = init_params(kp, cfg["latent_dim"], cfg["output_feature"])

        out = jax.block_until_ready(decoder2_forward(x, params))
        ref = decoder2_reference(x, params)

        assert out.shape == (cfg["batch"], cfg["output_feature"])
        assert jnp.allclose(out, ref, atol=1e-3, rtol=1e-3), f"mismatch vs reference: {cfg}"

    print("KERNEL_OK")
</pallas_src>

<mosaic_0001>
module attributes {stable_mosaic.version = 11 : i64} {
  func.func @decoder2_kernel(%arg0: i32, %arg1: i32, %arg2: memref<8x128xf32, #tpu.memory_space<vmem>>, %arg3: memref<128x128xf32, #tpu.memory_space<vmem>>, %arg4: memref<1x128xf32, #tpu.memory_space<vmem>>, %arg5: memref<1x128xf32, #tpu.memory_space<vmem>>, %arg6: memref<1x128xf32, #tpu.memory_space<vmem>>, %arg7: memref<128x128xf32, #tpu.memory_space<vmem>>, %arg8: memref<1x128xf32, #tpu.memory_space<vmem>>, %arg9: memref<8x128xf32, #tpu.memory_space<vmem>>, %arg10: memref<8x128xf32, #tpu.memory_space<vmem>>) attributes {dimension_semantics = [#tpu.dimension_semantics<parallel>, #tpu.dimension_semantics<arbitrary>], iteration_bounds = array<i64: 1, 1>, scalar_prefetch = 0 : i64, scratch_operands = 1 : i64, tpu.core_type = #tpu.core_type<tc>, window_params = [{pipeline_mode = #tpu.pipeline_mode<synchronous>, transform_indices = @transform_0, window_bounds = array<i64: 8, 128>}, {pipeline_mode = #tpu.pipeline_mode<synchronous>, transform_indices = @transform_1, window_bounds = array<i64: 128, 128>}, {pipeline_mode = #tpu.pipeline_mode<synchronous>, transform_indices = @transform_2, window_bounds = array<i64: 1, 128>}, {pipeline_mode = #tpu.pipeline_mode<synchronous>, transform_indices = @transform_3, window_bounds = array<i64: 1, 128>}, {pipeline_mode = #tpu.pipeline_mode<synchronous>, transform_indices = @transform_4, window_bounds = array<i64: 1, 128>}, {transform_indices = @transform_5, window_bounds = array<i64: 128, 128>}, {transform_indices = @transform_6, window_bounds = array<i64: 1, 128>}, {transform_indices = @transform_7, window_bounds = array<i64: 8, 128>}]} {
    %c0_i32 = arith.constant 0 : i32
    %0 = arith.cmpi eq, %arg1, %c0_i32 : i32
    %1 = arith.extui %0 : i1 to i32
    %c0_i32_0 = arith.constant 0 : i32
    %2 = arith.cmpi ne, %1, %c0_i32_0 : i32
    scf.if %2 {
      %c0_9 = arith.constant 0 : index
      %c0_10 = arith.constant 0 : index
      %12 = vector.load %arg2[%c0_9, %c0_10] : memref<8x128xf32, #tpu.memory_space<vmem>>, vector<8x128xf32>
      %c0_11 = arith.constant 0 : index
      %c0_12 = arith.constant 0 : index
      %13 = vector.load %arg3[%c0_11, %c0_12] : memref<128x128xf32, #tpu.memory_space<vmem>>, vector<128x128xf32>
      %cst_13 = arith.constant dense<0.000000e+00> : vector<8x128xf32>
      %14 = tpu.matmul %12, %13, %cst_13 {dimension_numbers = #tpu.dot_dimension_numbers<[1], [0], [0], [1], [0, 0, 1, 1], [], []>} : vector<8x128xf32>, vector<128x128xf32>, vector<8x128xf32> -> vector<8x128xf32>
      %c0_14 = arith.constant 0 : index
      %c0_15 = arith.constant 0 : index
      %15 = vector.load %arg4[%c0_14, %c0_15] : memref<1x128xf32, #tpu.memory_space<vmem>>, vector<1x128xf32>
      %16 = vector.broadcast %15 : vector<1x128xf32> to vector<8x128xf32>
      %17 = arith.addf %14, %16 : vector<8x128xf32>
      %cst_16 = arith.constant dense<0.000000e+00> : vector<128xf32>
      %18 = vector.multi_reduction <add>, %17, %cst_16 [0] : vector<8x128xf32> to vector<128xf32>
      %19 = vector.shape_cast %18 : vector<128xf32> to vector<1x128xf32>
      %cst_17 = arith.constant 1.250000e-01 : f32
      %20 = vector.broadcast %cst_17 : f32 to vector<1x128xf32>
      %21 = arith.mulf %19, %20 : vector<1x128xf32>
      %22 = vector.broadcast %21 : vector<1x128xf32> to vector<8x128xf32>
      %23 = arith.subf %17, %22 : vector<8x128xf32>
      %24 = arith.mulf %23, %23 : vector<8x128xf32>
      %cst_18 = arith.constant dense<0.000000e+00> : vector<128xf32>
      %25 = vector.multi_reduction <add>, %24, %cst_18 [0] : vector<8x128xf32> to vector<128xf32>
      %26 = vector.shape_cast %25 : vector<128xf32> to vector<1x128xf32>
      %cst_19 = arith.constant 1.250000e-01 : f32
      %27 = vector.broadcast %cst_19 : f32 to vector<1x128xf32>
      %28 = arith.mulf %26, %27 : vector<1x128xf32>
      %cst_20 = arith.constant 9.99999974E-6 : f32
      %29 = vector.broadcast %cst_20 : f32 to vector<1x128xf32>
      %30 = arith.addf %28, %29 : vector<1x128xf32>
      %31 = math.rsqrt %30 : vector<1x128xf32>
      %c0_21 = arith.constant 0 : index
      %c0_22 = arith.constant 0 : index
      %32 = vector.load %arg5[%c0_21, %c0_22] : memref<1x128xf32, #tpu.memory_space<vmem>>, vector<1x128xf32>
      %33 = arith.mulf %31, %32 : vector<1x128xf32>
      %34 = vector.broadcast %33 : vector<1x128xf32> to vector<8x128xf32>
      %35 = arith.mulf %23, %34 : vector<8x128xf32>
      %c0_23 = arith.constant 0 : index
      %c0_24 = arith.constant 0 : index
      %36 = vector.load %arg6[%c0_23, %c0_24] : memref<1x128xf32, #tpu.memory_space<vmem>>, vector<1x128xf32>
      %37 = vector.broadcast %36 : vector<1x128xf32> to vector<8x128xf32>
      %38 = arith.addf %35, %37 : vector<8x128xf32>
      %cst_25 = arith.constant 0.000000e+00 : f32
      %39 = vector.broadcast %cst_25 : f32 to vector<8x128xf32>
      %40 = arith.cmpf oge, %38, %39 : vector<8x128xf32>
      %cst_26 = arith.constant 0.00999999977 : f32
      %41 = vector.broadcast %cst_26 : f32 to vector<8x128xf32>
      %42 = arith.mulf %41, %38 : vector<8x128xf32>
      %43 = arith.select %40, %38, %42 : vector<8x128xi1>, vector<8x128xf32>
      %c0_27 = arith.constant 0 : index
      %c0_28 = arith.constant 0 : index
      %44 = vector.load %arg10[%c0_27, %c0_28] : memref<8x128xf32, #tpu.memory_space<vmem>>, vector<8x128xf32>
      tpu.vector_store %arg10[%c0_27, %c0_28], %43 {strides = array<i32>} : memref<8x128xf32, #tpu.memory_space<vmem>>, vector<8x128xf32>,
    } else {
    }
    %c0 = arith.constant 0 : index
    %c0_1 = arith.constant 0 : index
    %3 = vector.load %arg10[%c0, %c0_1] : memref<8x128xf32, #tpu.memory_space<vmem>>, vector<8x128xf32>
    %c0_2 = arith.constant 0 : index
    %c0_3 = arith.constant 0 : index
    %4 = vector.load %arg7[%c0_2, %c0_3] : memref<128x128xf32, #tpu.memory_space<vmem>>, vector<128x128xf32>
    %cst = arith.constant dense<0.000000e+00> : vector<8x128xf32>
    %5 = tpu.matmul %3, %4, %cst {dimension_numbers = #tpu.dot_dimension_numbers<[1], [0], [0], [1], [0, 0, 1, 1], [], []>} : vector<8x128xf32>, vector<128x128xf32>, vector<8x128xf32> -> vector<8x128xf32>
    %c0_4 = arith.constant 0 : index
    %c0_5 = arith.constant 0 : index
    %6 = vector.load %arg8[%c0_4, %c0_5] : memref<1x128xf32, #tpu.memory_space<vmem>>, vector<1x128xf32>
    %7 = vector.broadcast %6 : vector<1x128xf32> to vector<8x128xf32>
    %8 = arith.addf %5, %7 : vector<8x128xf32>
    %cst_6 = arith.constant 0.000000e+00 : f32
    %9 = vector.broadcast %cst_6 : f32 to vector<8x128xf32>
    %10 = arith.maximumf %8, %9 : vector<8x128xf32>
    %c0_7 = arith.constant 0 : index
    %c0_8 = arith.constant 0 : index
    %11 = vector.load %arg9[%c0_7, %c0_8] : memref<8x128xf32, #tpu.memory_space<vmem>>, vector<8x128xf32>
    tpu.vector_store %arg9[%c0_7, %c0_8], %10 {strides = array<i32>} : memref<8x128xf32, #tpu.memory_space<vmem>>, vector<8x128xf32>,
    return
  }
  func.func @transform_0(%arg0: i32, %arg1: i32) -> (i32, i32) {
    %c0_i32 = arith.constant 0 : i32
    %c0_i32_0 = arith.constant 0 : i32
    %c0_i32_1 = arith.constant 0 : i32
    return %c0_i32, %c0_i32_0 : i32, i32
  }
  func.func @transform_1(%arg0: i32, %arg1: i32) -> (i32, i32) {
    %c0_i32 = arith.constant 0 : i32
    %c0_i32_0 = arith.constant 0 : i32
    %c0_i32_1 = arith.constant 0 : i32
    return %c0_i32, %c0_i32_0 : i32, i32
  }
  func.func @transform_2(%arg0: i32, %arg1: i32) -> (i32, i32) {
    %c0_i32 = arith.constant 0 : i32
    %c0_i32_0 = arith.constant 0 : i32
    %c0_i32_1 = arith.constant 0 : i32
    return %c0_i32, %c0_i32_0 : i32, i32
  }
  func.func @transform_3(%arg0: i32, %arg1: i32) -> (i32, i32) {
    %c0_i32 = arith.constant 0 : i32
    %c0_i32_0 = arith.constant 0 : i32
    %c0_i32_1 = arith.constant 0 : i32
    return %c0_i32, %c0_i32_0 : i32, i32
  }
  func.func @transform_4(%arg0: i32, %arg1: i32) -> (i32, i32) {
    %c0_i32 = arith.constant 0 : i32
    %c0_i32_0 = arith.constant 0 : i32
    %c0_i32_1 = arith.constant 0 : i32
    return %c0_i32, %c0_i32_0 : i32, i32
  }
  func.func @transform_5(%arg0: i32, %arg1: i32) -> (i32, i32) {
    %c1_i32 = arith.constant 1 : i32
    %0 = arith.muli %arg0, %c1_i32 : i32
    %1 = arith.addi %0, %arg1 : i32
    %c0_i32 = arith.constant 0 : i32
    %c0_i32_0 = arith.constant 0 : i32
    return %c0_i32, %1 : i32, i32
  }
  func.func @transform_6(%arg0: i32, %arg1: i32) -> (i32, i32) {
    %c1_i32 = arith.constant 1 : i32
    %0 = arith.muli %arg0, %c1_i32 : i32
    %1 = arith.addi %0, %arg1 : i32
    %c0_i32 = arith.constant 0 : i32
    %c0_i32_0 = arith.constant 0 : i32
    return %c0_i32, %1 : i32, i32
  }
  func.func @transform_7(%arg0: i32, %arg1: i32) -> (i32, i32) {
    %c1_i32 = arith.constant 1 : i32
    %0 = arith.muli %arg0, %c1_i32 : i32
    %1 = arith.addi %0, %arg1 : i32
    %c0_i32 = arith.constant 0 : i32
    %c0_i32_0 = arith.constant 0 : i32
    return %c0_i32, %1 : i32, i32
  }
}

</mosaic_0001>

<bundles_post_ra>
// kernel: tpu_custom_call.1
= control target key start
LH: loop header
LB: loop body
LE: loop exit
PB: predicated region body
PF: predicated region fallthrough
CT: control target
= control target key end

     0   :  { %12 = vsyncpa [#allocation4], 0  ;;  %s729_s0 = inlined_call_operand.hbm [shape: f32[8,128], index: 0, kind: input, shape index: {}]   ;;  %s730_s1 = inlined_call_operand.hbm [shape: f32[128,128], index: 1, kind: input, shape index: {}]   ;;  %s731_s2 = inlined_call_operand.vmem [shape: f32[1,128], index: 2, kind: input, shape index: {}]   ;;  %s732_s3 = inlined_call_operand.vmem [shape: f32[1,128], index: 3, kind: input, shape index: {}]   ;;  %s733_s4 = inlined_call_operand.vmem [shape: f32[1,128], index: 4, kind: input, shape index: {}]   ;;  %s734_s5 = inlined_call_operand.hbm [shape: f32[128,128], index: 5, kind: input, shape index: {}]   ;;  %s735_s6 = inlined_call_operand.vmem [shape: f32[1,128], index: 6, kind: input, shape index: {}]   ;;  %s736_s7 = inlined_call_operand.hbm [shape: f32[8,128], index: 7, kind: output, shape index: {}]  }
   0x1   :  { %13 = vsyncpa [#allocation7], 0 }
   0x2   :  { %14 = vsyncpa [#allocation5], 0  ;;  %s598_s24 = smov [#allocation6]   ;;  %s504_s28 = scalar_lea.hbm %s730_s1, 2048 }
   0x3   :  { %s30_s25 = sshll.u32 %s598_s24, 4  ;;  %p505_p0 = scmp.ne.s32.totalorder %s730_s1, %s504_s28  ;;  %s31_s25 = int_to_ptr.vmem [resolvable:$true] %s30_s25 }
   0x4   :  { %p508_p1 = scmp.lt.u32.totalorder %s504_s28, %s730_s1 }
   0x6   :  { %p510_p2 = pnand %p508_p1, %p505_p0 }
   0x8   :  { %513 = shalt.err (!%p510_p2)
}
   0x9   :  { %s514_s10 = scalar_lea.vmem %s31_s25, 2048  ;;  %p519_p4 = scmp.lt.s32.totalorder %s31_s25, %s31_s25 }
   0xa   :  { %p515_p3 = scmp.ne.s32.totalorder %s31_s25, %s514_s10  ;;  %p520_p5 = scmp.lt.s32.totalorder %s514_s10, %s514_s10 }
   0xc   :  { %p521_p6 = por %p520_p5, %p519_p4 }
   0xe   :  { %p522_p7 = pnand %p521_p6, %p515_p3 }
  0x10   :  { %525 = shalt.err (!%p522_p7)
}
  0x11   :  { %s599_s11 = smov 128   ;;  %s600_s12 = smov 8  }
  0x12   :  { %36 = dma.hbm_to_vmem [thread:$0]  %s730_s1, 2048, %s31_s25, [#allocation7], %s599_s11, %s599_s11, %s600_s12  }
  0x13   :  { %s601_s15 = smov [#allocation3]   ;;  %s602_s17 = smov [#allocation8]  }
  0x14   :  { %s21_s16 = sshll.u32 %s601_s15, 4  ;;  %s51_s18 = sshll.u32 %s602_s17, 4  ;;  %s22_s16 = int_to_ptr.vmem [resolvable:$true] %s21_s16  ;;  %s52_s18 = int_to_ptr.vmem [resolvable:$true] %s51_s18 }
  0x15   :  { %s526_s21 = scalar_lea.hbm %s729_s0, 128 }
  0x16   :  { %p527_p8 = scmp.ne.s32.totalorder %s729_s0, %s526_s21  ;;  %p530_p9 = scmp.lt.u32.totalorder %s526_s21, %s729_s0 }
  0x18   :  { %p532_p10 = pnand %p530_p9, %p527_p8 }
  0x1a   :  { %535 = shalt.err (!%p532_p10)
}
  0x1b   :  { %s536_s1 = scalar_lea.vmem %s22_s16, 128  ;;  %p541_p12 = scmp.lt.s32.totalorder %s22_s16, %s22_s16 }
  0x1c   :  { %p537_p11 = scmp.ne.s32.totalorder %s22_s16, %s536_s1  ;;  %p542_p13 = scmp.lt.s32.totalorder %s536_s1, %s536_s1 }
  0x1e   :  { %p543_p0 = por %p542_p13, %p541_p12 }
  0x20   :  { %p544_p1 = pnand %p543_p0, %p537_p11 }
  0x22   :  { %547 = shalt.err (!%p544_p1)
}
  0x23   :  { %24 = dma.hbm_to_vmem [thread:$0]  %s729_s0, 128, %s22_s16, [#allocation4]  }
  0x24   :  { %s548_s30 = scalar_lea.hbm %s734_s5, 2048 }
  0x25   :  { %p549_p2 = scmp.ne.s32.totalorder %s734_s5, %s548_s30  ;;  %p552_p3 = scmp.lt.u32.totalorder %s548_s30, %s734_s5 }
  0x27   :  { %p554_p4 = pnand %p552_p3, %p549_p2 }
  0x29   :  { %557 = shalt.err (!%p554_p4)
}
  0x2a   :  { %s558_s14 = scalar_lea.vmem %s52_s18, 2048  ;;  %p563_p6 = scmp.lt.s32.totalorder %s52_s18, %s52_s18 }
  0x2b   :  { %p559_p5 = scmp.ne.s32.totalorder %s52_s18, %s558_s14  ;;  %p564_p7 = scmp.lt.s32.totalorder %s558_s14, %s558_s14 }
  0x2d   :  { %p565_p8 = por %p564_p7, %p563_p6 }
  0x2f   :  { %p566_p9 = pnand %p565_p8, %p559_p5 }
  0x31   :  { %569 = shalt.err (!%p566_p9)
}
  0x32   :  { %57 = dma.hbm_to_vmem [thread:$0]  %s734_s5, 2048, %s52_s18, [#allocation7], %s599_s11, %s599_s11, %s600_s12  }
  0x33   :  { %592 = dma.done.wait [#allocation4], 128  }
  0x34   :  { %593 = vsyncadd [#allocation4], 4294967168 }
  0x35   :  { %594 = dma.done.wait [#allocation7], 4096  }
  0x36   :  { %595 = vsyncadd [#allocation7], 4294963200  ;;  %v603_v0 = vmov 0.0|0.0   ;;  %vm604_vm0 = vmmov 0   ;;  %v605_v1 = vmov 0.0   ;;  %v90_v2 = vld [vmem:[#allocation6] sm:$0xff] }
  0x37   :  { %445 = vmatprep.subr.bf16.mxu0 %v603_v0  ;;  %407 = vmatprep.mubr.msk.f32.mxu0 %vm604_vm0, %v605_v1  ;;  %v91_v3 = vld [vmem:[#allocation6 + $0x8] sm:$0xff]  ;;  %v92_v4 = vld [vmem:[#allocation6 + $0x10] sm:$0xff]  ;;  %v93_v6 = vld [vmem:[#allocation6 + $0x18] sm:$0xff] }
  0x38   :  { %469 = vmatprep.subr.bf16.mxu1 %v603_v0  ;;  %442 = vmatprep.mubr.msk.f32.mxu1 %vm604_vm0, %v605_v1  ;;  %v446_v5 = vpack.c.bf16 %v91_v3, %v90_v2  ;;  %v449_v7 = vpack.c.bf16 %v93_v6, %v92_v4  ;;  %v94_v8 = vld [vmem:[#allocation6 + $0x20] sm:$0xff]  ;;  %v95_v9 = vld [vmem:[#allocation6 + $0x28] sm:$0xff]  ;;  %v96_v11 = vld [vmem:[#allocation6 + $0x30] sm:$0xff] }
  0x39   :  { %v452_v10 = vpack.c.bf16 %v95_v9, %v94_v8  ;;  %v97_v12 = vld [vmem:[#allocation6 + $0x38] sm:$0xff]  ;;  %v98_v14 = vld [vmem:[#allocation6 + $0x40] sm:$0xff]  ;;  %v99_v15 = vld [vmem:[#allocation6 + $0x48] sm:$0xff]  ;;  %v203_v8 = vlaneseq }
  0x3a   :  { %447 = vmatpush3.bf16.msra.mxu0 %v446_v5  ;;  %v455_v13 = vpack.c.bf16 %v97_v12, %v96_v11  ;;  %v458_v16 = vpack.c.bf16 %v99_v15, %v98_v14  ;;  %v100_v17 = vld [vmem:[#allocation6 + $0x50] sm:$0xff]  ;;  %v101_v18 = vld [vmem:[#allocation6 + $0x58] sm:$0xff]  ;;  %v102_v20 = vld [vmem:[#allocation6 + $0x60] sm:$0xff] }
  0x3b   :  { %448 = vmatprep.subr.bf16.mxu0 %v603_v0  ;;  %v461_v19 = vpack.c.bf16 %v101_v18, %v100_v17  ;;  %v103_v21 = vld [vmem:[#allocation6 + $0x68] sm:$0xff]  ;;  %v104_v23 = vld [vmem:[#allocation6 + $0x70] sm:$0xff]  ;;  %v105_v24 = vld [vmem:[#allocation6 + $0x78] sm:$0xff]  ;;  %v204_v9 = vshrl.u32 %v203_v8, 7 }
  0x3c   :  { %v464_v22 = vpack.c.bf16 %v103_v21, %v102_v20  ;;  %v467_v25 = vpack.c.bf16 %v105_v24, %v104_v23  ;;  %v89_v26 = vld [vmem:[#allocation3] sm:$0xff]  ;;  %v221_v27 = vld [vmem:[#allocation8] sm:$0xff]  ;;  %v222_v28 = vld [vmem:[#allocation8 + $0x8] sm:$0xff] }
  0x3d   :  { %v470_v29 = vpack.c.bf16 %v222_v28, %v221_v27  ;;  %v223_v30 = vld [vmem:[#allocation8 + $0x10] sm:$0xff]  ;;  %v224_v31 = vld [vmem:[#allocation8 + $0x18] sm:$0xff]  ;;  %v225_v33 = vld [vmem:[#allocation8 + $0x20] sm:$0xff]  ;;  %v205_v11 = vsub.s32 0, %v204_v9 }
  0x3e   :  { %450 = vmatpush3.bf16.msra.mxu0 %v449_v7  ;;  %v473_v32 = vpack.c.bf16 %v224_v31, %v223_v30  ;;  %v226_v34 = vld [vmem:[#allocation8 + $0x28] sm:$0xff]  ;;  %v227_v36 = vld [vmem:[#allocation8 + $0x30] sm:$0xff]  ;;  %v228_v37 = vld [vmem:[#allocation8 + $0x38] sm:$0xff] }
  0x3f   :  { %451 = vmatprep.subr.bf16.mxu0 %v603_v0  ;;  %471 = vmatpush3.bf16.msra.mxu1 %v470_v29  ;;  %v476_v35 = vpack.c.bf16 %v226_v34, %v225_v33  ;;  %v479_v38 = vpack.c.bf16 %v228_v37, %v227_v36  ;;  %v229_v39 = vld [vmem:[#allocation8 + $0x40] sm:$0xff]  ;;  %v230_v40 = vld [vmem:[#allocation8 + $0x48] sm:$0xff]  ;;  %v231_v42 = vld [vmem:[#allocation8 + $0x50] sm:$0xff] }
  0x40   :  { %472 = vmatprep.subr.bf16.mxu1 %v603_v0  ;;  %v482_v41 = vpack.c.bf16 %v230_v40, %v229_v39  ;;  %v232_v43 = vld [vmem:[#allocation8 + $0x58] sm:$0xff]  ;;  %v233_v45 = vld [vmem:[#allocation8 + $0x60] sm:$0xff]  ;;  %v234_v46 = vld [vmem:[#allocation8 + $0x68] sm:$0xff] }
  0x41   :  { %v485_v44 = vpack.c.bf16 %v232_v43, %v231_v42  ;;  %v488_v47 = vpack.c.bf16 %v234_v46, %v233_v45  ;;  %v235_v48 = vld [vmem:[#allocation8 + $0x70] sm:$0xff]  ;;  %v236_v49 = vld [vmem:[#allocation8 + $0x78] sm:$0xff] }
  0x42   :  { %453 = vmatpush3.bf16.msra.mxu0 %v452_v10  ;;  %v491_v50 = vpack.c.bf16 %v236_v49, %v235_v48  ;;  %v338_v51 = vld [vmem:[%s731_s2] ss:$0 sm:$0xff] }
  0x43   :  { %454 = vmatprep.subr.bf16.mxu0 %v603_v0  ;;  %474 = vmatpush3.bf16.msra.mxu1 %v473_v32  ;;  %v201_v10 = vld [vmem:[%s732_s3] sm:$0x1]  ;;  %s606_s3 = smov [#allocation9]  }
  0x44   :  { %475 = vmatprep.subr.bf16.mxu1 %v603_v0  ;;  %v339_v15 = vld [vmem:[%s733_s4] ss:$0 sm:$0xff]  ;;  %s325_s20 = sshll.u32 %s606_s3, 4  ;;  %s326_s20 = int_to_ptr.vmem [resolvable:$true] %s325_s20 }
  0x45   :  { %v340_v20 = vld [vmem:[%s735_s6] ss:$0 sm:$0xff]  ;;  %s570_s21 = scalar_lea.vmem %s326_s20, 128  ;;  %p575_p11 = scmp.lt.s32.totalorder %s326_s20, %s326_s20 }
  0x46   :  { %456 = vmatpush3.bf16.msra.mxu0 %v455_v13  ;;  %p571_p10 = scmp.ne.s32.totalorder %s326_s20, %s570_s21  ;;  %p576_p12 = scmp.lt.s32.totalorder %s570_s21, %s570_s21 }
  0x47   :  { %457 = vmatprep.subr.bf16.mxu0 %v603_v0  ;;  %477 = vmatpush3.bf16.msra.mxu1 %v476_v35 }
  0x48   :  { %478 = vmatprep.subr.bf16.mxu1 %v603_v0  ;;  %p577_p13 = por %p576_p12, %p575_p11 }
  0x4a   :  { %459 = vmatpush3.bf16.msra.mxu0 %v458_v16  ;;  %p578_p0 = pnand %p577_p13, %p571_p10 }
  0x4b   :  { %460 = vmatprep.subr.bf16.mxu0 %v603_v0  ;;  %480 = vmatpush3.bf16.msra.mxu1 %v479_v38 }
  0x4c   :  { %481 = vmatprep.subr.bf16.mxu1 %v603_v0 }
  0x4e   :  { %462 = vmatpush3.bf16.msra.mxu0 %v461_v19 }
  0x4f   :  { %463 = vmatprep.subr.bf16.mxu0 %v603_v0  ;;  %483 = vmatpush3.bf16.msra.mxu1 %v482_v41 }
  0x50   :  { %484 = vmatprep.subr.bf16.mxu1 %v603_v0 }
  0x52   :  { %465 = vmatpush3.bf16.msra.mxu0 %v464_v22 }
  0x53   :  { %466 = vmatprep.subr.bf16.mxu0 %v603_v0  ;;  %486 = vmatpush3.bf16.msra.mxu1 %v485_v44 }
  0x54   :  { %487 = vmatprep.subr.bf16.mxu1 %v603_v0 }
  0x56   :  { %468 = vmatpush3.bf16.msra.mxu0 %v467_v25 }
  0x57   :  { %489 = vmatpush3.bf16.msra.mxu1 %v488_v47 }
  0x58   :  { %490 = vmatprep.subr.bf16.mxu1 %v603_v0 }
  0x59   :  { %408 = vmatmul.mubr.f32.vlgmr.msra.gmra.mrb[0].mxu0 %v89_v26 }
  0x5b   :  { %492 = vmatpush3.bf16.msra.mxu1 %v491_v50 }
 0x12c   :  { %v179_v52 = vpop.f32.mrb[0].mxu0 }
 0x12d   :  { %v180_v53 = vadd.f32 %v338_v51, %v179_v52  ;;  %v409_v54 = vpop.f32.mrb[1].mxu0 }
 0x12f   :  { %v183_v55 = vrot.slane %v180_v53, 4 }
 0x131   :  { %v184_v56 = vadd.f32 %v183_v55, %v180_v53 }
 0x133   :  { %v185_v57 = vrot.slane %v184_v56, 2 }
 0x135   :  { %v186_v58 = vadd.f32 %v185_v57, %v184_v56 }
 0x137   :  { %v187_v59 = vrot.slane %v186_v58, 1 }
 0x139   :  { %v188_v60 = vadd.f32 %v187_v59, %v186_v58 }
 0x13b   :  { %v189_v61 = vmul.f32 0.125, %v188_v60 }
 0x13d   :  { %v190_v62 = vsub.f32 %v180_v53, %v189_v61 }
 0x13f   :  { %v191_v63 = vmul.f32 %v190_v62, %v190_v62 }
 0x141   :  { %v192_v1 = vrot.slane %v191_v63, 4 }
 0x143   :  { %v193_v0 = vadd.f32 %v192_v1, %v191_v63 }
 0x145   :  { %v194_v2 = vrot.slane %v193_v0, 2 }
 0x147   :  { %v195_v3 = vadd.f32 %v194_v2, %v193_v0 }
 0x149   :  { %v196_v4 = vrot.slane %v195_v3, 1 }
 0x14b   :  { %v197_v5 = vadd.f32 %v196_v4, %v195_v3 }
 0x14d   :  { %v198_v6 = vmul.f32 0.125, %v197_v5 }
 0x14f   :  { %v199_v7 = vadd.f32 1e-05, %v198_v6 }
 0x151   :  { %502 = vrsqrt.f32 %v199_v7 }
 0x15b   :  { %v503_v12 = vpop.eup %502 }
 0x15c   :  { %v202_v13 = vmul.f32 %v503_v12, %v201_v10 }
 0x15e   :  { %v206_v14 = vrot.slane %v202_v13, %v205_v11 }
 0x160   :  { %v207_v16 = vmul.f32 %v206_v14, %v190_v62 }
 0x162   :  { %v215_v17 = vadd.f32 %v339_v15, %v207_v16 }
 0x164   :  { %vm216_vm1 = vcmp.ge.f32.partialorder %v215_v17, 0.0  ;;  %v217_v18 = vmul.f32 0.01, %v215_v17 }
 0x166   :  { %v218_v19 = vsel %vm216_vm1, %v215_v17, %v217_v18 }
 0x167   :  { %443 = vmatmul.mubr.f32.vlgmr.msra.gmra.mrb[0].mxu1 %v218_v19 }
 0x23a   :  { %v310_v21 = vpop.f32.mrb[0].mxu1 }
 0x23b   :  { %v311_v22 = vadd.f32 %v340_v20, %v310_v21  ;;  %v444_v23 = vpop.f32.mrb[1].mxu1 }
 0x23d   :  { %v314_v24 = vmax.f32 %v311_v22, 0.0 }
 0x23f   :  { %315 = vst [vmem:[#allocation9] sm:$0xff] %v314_v24 }
 0x240   :  { %581 = shalt.err (!%p578_p0)
}
 0x241   :  { %s582_s23 = scalar_lea.hbm %s736_s7, 128 }
 0x242   :  { %p583_p1 = scmp.ne.s32.totalorder %s736_s7, %s582_s23  ;;  %p586_p2 = scmp.lt.u32.totalorder %s582_s23, %s736_s7 }
 0x244   :  { %p588_p3 = pnand %p586_p2, %p583_p1 }
 0x246   :  { %591 = shalt.err (!%p588_p3)
}
 0x247   :  { %328 = dma.vmem_to_hbm [thread:$0]  %s326_s20, 128, %s736_s7, [#allocation5]  }
 0x248   :  { %596 = dma.done.wait [#allocation5], 128  }
 0x249   :  { %597 = vsyncadd [#allocation5], 4294967168 }
 0x24a   :  { %332 = vsyncpa [#allocation4], 1 }
 0x24b   :  { %333 = vsyncpa [#allocation7], 1 }
 0x24c   :  { %334 = vsyncpa [#allocation5], 1 }

</bundles_post_ra>
